<compile_context>
chip_gen: v5e
topology: v5e:2x2
jax: 0.10.0
libtpu: 0.0.40
codegen_flags: <defaults>
</compile_context>

<pallas_src>
import jax
import jax.numpy as jnp
import numpy as np
from jax.experimental import pallas as pl
from jax.experimental.pallas import tpu as pltpu


# ----------------------------- Pallas kernel --------------------------------
def _loss_kernel(pack_ref, row_ref, col_ref, t1_ref, t3_ref, t4_ref):
    """Partial sums for term1, term3, term4 over one row-tile.

    pack_ref: (4, TM, N)  [rel_x, rel_y, inv_sigma_g, alpha_g]
    row_ref:  (TM, 8)     [abs_x, abs_y, xv, xv0, inv_sigma_cv, 0, 0, 0]
    col_ref:  (8, N)      [abs_x, abs_y, xv, 0, ...]
    """
    @pl.when(pl.program_id(0) == 0)
    def _():
        t1_ref[...] = jnp.zeros_like(t1_ref)
        t3_ref[...] = jnp.zeros_like(t3_ref)
        t4_ref[...] = jnp.zeros_like(t4_ref)

    relx = pack_ref[0]                     # (TM, N)
    rely = pack_ref[1]                     # (TM, N)
    inv_sig = pack_ref[2]                  # (TM, N)  precomputed 1/sigma_g
    alp = pack_ref[3]                      # (TM, N)

    abs_x_i = row_ref[:, 0:1]              # (TM, 1)
    abs_y_i = row_ref[:, 1:2]              # (TM, 1)
    xv_i = row_ref[:, 2:3]                 # (TM, 1)
    xv0_i = row_ref[:, 3:4]                # (TM, 1)
    inv_scv_i = row_ref[:, 4:5]            # (TM, 1)  precomputed 1/sigma_cv

    abs_x_j = col_ref[0:1, :]              # (1, N)
    abs_y_j = col_ref[1:2, :]              # (1, N)
    xv_j = col_ref[2:3, :]                 # (1, N)

    w = xv_i * xv_j                        # (TM, N)  xv[i] * xv[j]

    # diff_g[i, j, :] = txy_abs[j] - txy_abs[i] - txy_rel0[i, j]
    dx = abs_x_j - abs_x_i - relx          # (TM, N)
    dy = abs_y_j - abs_y_i - rely          # (TM, N)

    gx = dx * dx * w * inv_sig             # diff_g (x component) / sigma_g
    gy = dy * dy * w * inv_sig             # diff_g (y component) / sigma_g

    # Geman-McClure: GM(g, a) = g^2/(g^2 + a) = 1 - a/(g^2 + a)
    rx = 1.0 / (gx * gx + alp)
    ry = 1.0 / (gy * gy + alp)
    t3_ref[...] += jnp.sum(2.0 - alp * (rx + ry))

    dxv = xv_i - xv0_i                     # (TM, 1)
    t1_ref[...] += jnp.sum(dxv * dxv * inv_scv_i)
    t4_ref[...] += jnp.sum(xv_i * (1.0 - xv_i))


def _pairwise_terms(xv, xv0, inv_sigma_cv_all, txy_abs, txy_rel0,
                    inv_sigma_g, alpha_g, tm=None):
    """Run the Pallas kernel; returns (term1_sum, term3_sum, term4_sum)."""
    N = xv.shape[0]
    if tm is None:
        tm = N                             # single grid step at this size
    assert N % tm == 0, "N must be a multiple of the row tile"
    assert tm == N or tm % 8 == 0, "row tile must be N or a multiple of 8"
    f32 = jnp.float32

    # Packed (N, N) planes: rel_x, rel_y, 1/sigma_g, alpha_g  -> one DMA.
    pack = jnp.stack([txy_rel0[:, :, 0], txy_rel0[:, :, 1],
                      inv_sigma_g, alpha_g], axis=0).astype(f32)   # (4, N, N)

    zeros = jnp.zeros((N,), f32)
    # Packed per-row vectors -> one DMA.
    row_pack = jnp.stack([txy_abs[:, 0], txy_abs[:, 1], xv, xv0,
                          inv_sigma_cv_all, zeros, zeros, zeros],
                         axis=1).astype(f32)                       # (N, 8)
    # Packed per-column vectors -> one DMA.
    col_pack = jnp.stack([txy_abs[:, 0], txy_abs[:, 1], xv,
                          zeros, zeros, zeros, zeros, zeros],
                         axis=0).astype(f32)                       # (8, N)

    scal_out = pl.BlockSpec((1, 1), lambda i: (0, 0))
    out_shape = tuple(jax.ShapeDtypeStruct((1, 1), f32) for _ in range(3))

    t1, t3, t4 = pl.pallas_call(
        _loss_kernel,
        out_shape=out_shape,
        grid_spec=pltpu.PrefetchScalarGridSpec(
            num_scalar_prefetch=0,
            grid=(N // tm,),
            in_specs=[pl.BlockSpec((4, tm, N), lambda i: (0, i, 0)),
                      pl.BlockSpec((tm, 8), lambda i: (i, 0)),
                      pl.BlockSpec((8, N), lambda i: (0, 0))],
            out_specs=[scal_out, scal_out, scal_out]),
        compiler_params=pltpu.CompilerParams(
            dimension_semantics=("arbitrary",)),
    )(pack, row_pack, col_pack)

    return t1[0, 0], t3[0, 0], t4[0, 0]


# ------------------------------ small glue -----------------------------------
def _sigmoid_step(x, c, a=10.0):
    return 1.0 / (1.0 + jnp.exp(-(x - c) * a))


def _pxv_cont_array(x, params):
    return (jnp.abs(params[:, 0]) * jnp.exp(-(x - params[:, 2]) * (x - params[:, 2]) / params[:, 4])
            + jnp.abs(params[:, 1]) * jnp.exp(-(x - params[:, 3]) * (x - params[:, 3]) / params[:, 5]))


def _pxe_cont_array(x, y, params):
    x1 = x - params[:, 4]
    x2 = x - params[:, 6]
    x3 = x - params[:, 8]
    x4 = x - params[:, 10]
    y1 = y - params[:, 5]
    y2 = y - params[:, 7]
    y3 = y - params[:, 9]
    y4 = y - params[:, 11]
    a = params[:, 12]
    return (params[:, 0] * jnp.exp(-(a * x1 * x1 + a * y1 * y1))
            + params[:, 1] * jnp.exp(-(a * x2 * x2 + a * y2 * y2))
            + params[:, 2] * jnp.exp(-(a * x3 * x3 + a * y3 * y3))
            + params[:, 3] * jnp.exp(-(a * x4 * x4 + a * y4 * y4)))


def solver_xv_forward(xv_free, tn_abs_all, consts):
    """Pallas-backed forward, mirrors Solver_Xv.forward exactly."""
    C = consts['num_class']
    E = consts['num_each_class']
    N = C * E
    xv = 1.0 / (1.0 + jnp.exp(xv_free))

    # Constant reciprocals precomputed on the host (multiply in-kernel).
    inv_sigma_cv_all = 1.0 / jnp.repeat(consts['sigma_cv'], E)          # (N,)
    inv_sigma_g = 1.0 / jnp.repeat(jnp.repeat(consts['sigma_ce'], E, 0), E, 1)
    alpha_g = jnp.repeat(jnp.repeat(consts['alpha_ce'], E, 0), E, 1)    # (N, N)
    txy_abs = tn_abs_all[:, :2]
    txy_rel0 = consts['tn_rel_all0'][:, :, :2]

    t1_sum, t3_sum, t4_sum = _pairwise_terms(
        xv, consts['xv0'], inv_sigma_cv_all, txy_abs, txy_rel0,
        inv_sigma_g, alpha_g)

    term1 = t1_sum / N

    xvc = jnp.sum(_sigmoid_step(xv, 0.5, 10.0).reshape(C, E), axis=1)
    term2 = 2.0 * jnp.sum(
        -jnp.log(_pxv_cont_array(xvc, consts['pxv_params']) + 1e-6)) / N

    cp = consts['coexist_pairs']
    if cp.shape[0] != 0:
        gathered = consts['pxe_params'][cp[:, 0], cp[:, 1]]
        term5 = jnp.sum(-jnp.log(
            _pxe_cont_array(xvc[cp[:, 0]], xvc[cp[:, 1]], gathered) + 1e-6))
        term5 = 1.0 * term5 / cp.shape[0]
    else:
        term5 = 0.0

    term3 = 20.0 * t3_sum / N / N
    term4 = (t4_sum / N) * 10.0

    return term1 + term2 + term3 + term4 + term5


def reference_loss(xv_free, tn_abs_all, consts):
    """Pure-jnp reference that mirrors the PyTorch forward literally."""
    C = consts['num_class']
    E = consts['num_each_class']
    N = C * E
    xv = 1.0 / (1.0 + jnp.exp(xv_free))
    sigma_cv_all = jnp.repeat(consts['sigma_cv'], E)
    diff_xv = xv - consts['xv0']
    term1 = jnp.sum(diff_xv * diff_xv / sigma_cv_all)
    xvc = jnp.sum(_sigmoid_step(xv, 0.5, 10.0).reshape(C, E), axis=1)
    term2 = jnp.sum(-jnp.log(_pxv_cont_array(xvc, consts['pxv_params']) + 1e-6))
    cp = consts['coexist_pairs']
    if cp.shape[0] != 0:
        term5 = jnp.sum(-jnp.log(_pxe_cont_array(
            xvc[cp[:, 0]], xvc[cp[:, 1]],
            consts['pxe_params'][cp[:, 0], cp[:, 1]]) + 1e-6)) / cp.shape[0]
    else:
        term5 = 0.0
    txy_abs = tn_abs_all[:, :2]
    txy_rel0 = consts['tn_rel_all0'][:, :, :2]
    diff_g = txy_abs[None, :, :] - txy_abs[:, None, :] - txy_rel0
    diff_g = diff_g * diff_g * (xv[:, None] * xv[None, :])[:, :, None]
    sigma_g = jnp.repeat(jnp.repeat(consts['sigma_ce'], E, 0), E, 1)[:, :, None]
    alpha_g = jnp.repeat(jnp.repeat(consts['alpha_ce'], E, 0), E, 1)[:, :, None]
    diff_g = diff_g / sigma_g
    term3 = jnp.sum(diff_g * diff_g / (diff_g * diff_g + alpha_g))
    term1 = term1 / N
    term2 = 2.0 * term2 / N
    term3 = 20.0 * term3 / N / N
    term4 = jnp.mean(xv * (1.0 - xv)) * 10.0
    return term1 + term2 + term3 + term4 + term5


# --------------------------------- main ---------------------------------------
if __name__ == "__main__":
    key = jax.random.PRNGKey(0)
    ks = jax.random.split(key, 12)

    C, E = 4, 4                      # num_class, num_each_class
    N = C * E                        # max_parts = 16

    xv0 = jax.random.uniform(ks[0], (N,), minval=0.05, maxval=0.95)
    tn_rel_all0 = 0.5 * jax.random.normal(ks[1], (N, N, 3))
    tn_abs_all = 0.5 * jax.random.normal(ks[2], (N, 3))

    # pxv_params (C, 6): pi1, pi2, mu1, mu2, sigma1, sigma2  (sigmas > 0)
    pxv_params = jnp.concatenate([
        jax.random.uniform(ks[3], (C, 2), minval=0.1, maxval=1.0),
        jax.random.uniform(ks[4], (C, 2), minval=0.0, maxval=4.0),
        jax.random.uniform(ks[5], (C, 2), minval=0.5, maxval=2.0)], axis=1)

    # pxe_params (C, C, 13): A1..A4, mu1x..mu4y, a  (amplitudes, a > 0)
    pxe_params = jnp.concatenate([
        jax.random.uniform(ks[6], (C, C, 4), minval=0.1, maxval=1.0),
        jax.random.uniform(ks[7], (C, C, 8), minval=0.0, maxval=4.0),
        jax.random.uniform(ks[8], (C, C, 1), minval=0.1, maxval=1.0)], axis=2)

    coexist_pairs = jnp.array([[0, 1], [1, 2], [2, 3]], dtype=jnp.int32)

    sigma_cv = jax.random.uniform(ks[9], (C,), minval=0.5, maxval=2.0)
    sigma_ce = jax.random.uniform(ks[10], (C, C), minval=0.5, maxval=2.0)
    alpha_ce = jax.random.uniform(ks[11], (C, C), minval=0.5, maxval=2.0)

    # nn.Parameter init: xv_free = log(1/clip(xv0) - 1)
    xv0_clip = jnp.clip(xv0, 1e-6, 1.0 - 1e-6)
    xv_free = jnp.log(1.0 / xv0_clip - 1.0)

    consts = dict(num_class=C, num_each_class=E, xv0=xv0,
                  tn_rel_all0=tn_rel_all0, pxv_params=pxv_params,
                  pxe_params=pxe_params, coexist_pairs=coexist_pairs,
                  sigma_cv=sigma_cv, sigma_ce=sigma_ce, alpha_ce=alpha_ce)

    loss = solver_xv_forward(xv_free, tn_abs_all, consts)
    loss = jax.block_until_ready(loss)

    ref = jax.block_until_ready(reference_loss(xv_free, tn_abs_all, consts))
    np.testing.assert_allclose(np.asarray(loss), np.asarray(ref),
                               rtol=1e-4, atol=1e-4)
    print("KERNEL_OK")
</pallas_src>

<mosaic_0001>
module attributes {stable_mosaic.version = 11 : i64} {
  func.func @_loss_kernel(%arg0: i32, %arg1: memref<4x16x16xf32, #tpu.memory_space<vmem>>, %arg2: memref<16x8xf32, #tpu.memory_space<vmem>>, %arg3: memref<8x16xf32, #tpu.memory_space<vmem>>, %arg4: memref<1x1xf32, #tpu.memory_space<vmem>>, %arg5: memref<1x1xf32, #tpu.memory_space<vmem>>, %arg6: memref<1x1xf32, #tpu.memory_space<vmem>>) attributes {dimension_semantics = [#tpu.dimension_semantics<arbitrary>], iteration_bounds = array<i64: 1>, scalar_prefetch = 0 : i64, scratch_operands = 0 : i64, tpu.core_type = #tpu.core_type<tc>, window_params = [{transform_indices = @transform_0, window_bounds = array<i64: 4, 16, 16>}, {transform_indices = @transform_1, window_bounds = array<i64: 16, 8>}, {pipeline_mode = #tpu.pipeline_mode<synchronous>, transform_indices = @transform_2, window_bounds = array<i64: 8, 16>}, {pipeline_mode = #tpu.pipeline_mode<synchronous>, transform_indices = @transform_3, window_bounds = array<i64: 1, 1>}, {pipeline_mode = #tpu.pipeline_mode<synchronous>, transform_indices = @transform_4, window_bounds = array<i64: 1, 1>}, {pipeline_mode = #tpu.pipeline_mode<synchronous>, transform_indices = @transform_5, window_bounds = array<i64: 1, 1>}]} {
    %c0_i32 = arith.constant 0 : i32
    %0 = arith.cmpi eq, %arg0, %c0_i32 : i32
    %1 = arith.extui %0 : i1 to i32
    %c0_i32_0 = arith.constant 0 : i32
    %2 = arith.cmpi ne, %1, %c0_i32_0 : i32
    scf.if %2 {
      %cst_42 = arith.constant 0.000000e+00 : f32
      %78 = vector.broadcast %cst_42 : f32 to vector<1x1xf32>
      %c0_43 = arith.constant 0 : index
      %c0_44 = arith.constant 0 : index
      %79 = vector.load %arg4[%c0_43, %c0_44] : memref<1x1xf32, #tpu.memory_space<vmem>>, vector<1x1xf32>
      tpu.vector_store %arg4[%c0_43, %c0_44], %78 {strides = array<i32>} : memref<1x1xf32, #tpu.memory_space<vmem>>, vector<1x1xf32>,
      %cst_45 = arith.constant 0.000000e+00 : f32
      %80 = vector.broadcast %cst_45 : f32 to vector<1x1xf32>
      %c0_46 = arith.constant 0 : index
      %c0_47 = arith.constant 0 : index
      %81 = vector.load %arg5[%c0_46, %c0_47] : memref<1x1xf32, #tpu.memory_space<vmem>>, vector<1x1xf32>
      tpu.vector_store %arg5[%c0_46, %c0_47], %80 {strides = array<i32>} : memref<1x1xf32, #tpu.memory_space<vmem>>, vector<1x1xf32>,
      %cst_48 = arith.constant 0.000000e+00 : f32
      %82 = vector.broadcast %cst_48 : f32 to vector<1x1xf32>
      %c0_49 = arith.constant 0 : index
      %c0_50 = arith.constant 0 : index
      %83 = vector.load %arg6[%c0_49, %c0_50] : memref<1x1xf32, #tpu.memory_space<vmem>>, vector<1x1xf32>
      tpu.vector_store %arg6[%c0_49, %c0_50], %82 {strides = array<i32>} : memref<1x1xf32, #tpu.memory_space<vmem>>, vector<1x1xf32>,
    } else {
    }
    %c0 = arith.constant 0 : index
    %c0_1 = arith.constant 0 : index
    %c0_2 = arith.constant 0 : index
    %3 = vector.load %arg1[%c0, %c0_1, %c0_2] : memref<4x16x16xf32, #tpu.memory_space<vmem>>, vector<1x16x16xf32>
    %4 = vector.shape_cast %3 : vector<1x16x16xf32> to vector<16x16xf32>
    %c1 = arith.constant 1 : index
    %c0_3 = arith.constant 0 : index
    %c0_4 = arith.constant 0 : index
    %5 = vector.load %arg1[%c1, %c0_3, %c0_4] : memref<4x16x16xf32, #tpu.memory_space<vmem>>, vector<1x16x16xf32>
    %6 = vector.shape_cast %5 : vector<1x16x16xf32> to vector<16x16xf32>
    %c2 = arith.constant 2 : index
    %c0_5 = arith.constant 0 : index
    %c0_6 = arith.constant 0 : index
    %7 = vector.load %arg1[%c2, %c0_5, %c0_6] : memref<4x16x16xf32, #tpu.memory_space<vmem>>, vector<1x16x16xf32>
    %8 = vector.shape_cast %7 : vector<1x16x16xf32> to vector<16x16xf32>
    %c3 = arith.constant 3 : index
    %c0_7 = arith.constant 0 : index
    %c0_8 = arith.constant 0 : index
    %9 = vector.load %arg1[%c3, %c0_7, %c0_8] : memref<4x16x16xf32, #tpu.memory_space<vmem>>, vector<1x16x16xf32>
    %10 = vector.shape_cast %9 : vector<1x16x16xf32> to vector<16x16xf32>
    %c0_9 = arith.constant 0 : index
    %c0_10 = arith.constant 0 : index
    %11 = vector.load %arg2[%c0_9, %c0_10] : memref<16x8xf32, #tpu.memory_space<vmem>>, vector<16x1xf32>
    %c0_11 = arith.constant 0 : index
    %c1_12 = arith.constant 1 : index
    %12 = vector.load %arg2[%c0_11, %c1_12] : memref<16x8xf32, #tpu.memory_space<vmem>>, vector<16x1xf32>
    %c0_13 = arith.constant 0 : index
    %c2_14 = arith.constant 2 : index
    %13 = vector.load %arg2[%c0_13, %c2_14] : memref<16x8xf32, #tpu.memory_space<vmem>>, vector<16x1xf32>
    %c0_15 = arith.constant 0 : index
    %c3_16 = arith.constant 3 : index
    %14 = vector.load %arg2[%c0_15, %c3_16] : memref<16x8xf32, #tpu.memory_space<vmem>>, vector<16x1xf32>
    %c0_17 = arith.constant 0 : index
    %c4 = arith.constant 4 : index
    %15 = vector.load %arg2[%c0_17, %c4] : memref<16x8xf32, #tpu.memory_space<vmem>>, vector<16x1xf32>
    %c0_18 = arith.constant 0 : index
    %c0_19 = arith.constant 0 : index
    %16 = vector.load %arg3[%c0_18, %c0_19] : memref<8x16xf32, #tpu.memory_space<vmem>>, vector<1x16xf32>
    %c1_20 = arith.constant 1 : index
    %c0_21 = arith.constant 0 : index
    %17 = vector.load %arg3[%c1_20, %c0_21] : memref<8x16xf32, #tpu.memory_space<vmem>>, vector<1x16xf32>
    %c2_22 = arith.constant 2 : index
    %c0_23 = arith.constant 0 : index
    %18 = vector.load %arg3[%c2_22, %c0_23] : memref<8x16xf32, #tpu.memory_space<vmem>>, vector<1x16xf32>
    %19 = vector.broadcast %13 : vector<16x1xf32> to vector<16x16xf32>
    %20 = vector.broadcast %18 : vector<1x16xf32> to vector<16x16xf32>
    %21 = arith.mulf %19, %20 : vector<16x16xf32>
    %22 = vector.broadcast %16 : vector<1x16xf32> to vector<16x16xf32>
    %23 = vector.broadcast %11 : vector<16x1xf32> to vector<16x16xf32>
    %24 = arith.subf %22, %23 : vector<16x16xf32>
    %25 = arith.subf %24, %4 : vector<16x16xf32>
    %26 = vector.broadcast %17 : vector<1x16xf32> to vector<16x16xf32>
    %27 = vector.broadcast %12 : vector<16x1xf32> to vector<16x16xf32>
    %28 = arith.subf %26, %27 : vector<16x16xf32>
    %29 = arith.subf %28, %6 : vector<16x16xf32>
    %30 = arith.mulf %25, %25 : vector<16x16xf32>
    %31 = arith.mulf %30, %21 : vector<16x16xf32>
    %32 = arith.mulf %31, %8 : vector<16x16xf32>
    %33 = arith.mulf %29, %29 : vector<16x16xf32>
    %34 = arith.mulf %33, %21 : vector<16x16xf32>
    %35 = arith.mulf %34, %8 : vector<16x16xf32>
    %36 = arith.mulf %32, %32 : vector<16x16xf32>
    %37 = arith.addf %36, %10 : vector<16x16xf32>
    %cst = arith.constant 1.000000e+00 : f32
    %38 = vector.broadcast %cst : f32 to vector<16x16xf32>
    %39 = arith.divf %38, %37 : vector<16x16xf32>
    %40 = arith.mulf %35, %35 : vector<16x16xf32>
    %41 = arith.addf %40, %10 : vector<16x16xf32>
    %cst_24 = arith.constant 1.000000e+00 : f32
    %42 = vector.broadcast %cst_24 : f32 to vector<16x16xf32>
    %43 = arith.divf %42, %41 : vector<16x16xf32>
    %c0_25 = arith.constant 0 : index
    %c0_26 = arith.constant 0 : index
    %44 = vector.load %arg5[%c0_25, %c0_26] : memref<1x1xf32, #tpu.memory_space<vmem>>, vector<1x1xf32>
    %45 = arith.addf %39, %43 : vector<16x16xf32>
    %46 = arith.mulf %10, %45 : vector<16x16xf32>
    %cst_27 = arith.constant 2.000000e+00 : f32
    %47 = vector.broadcast %cst_27 : f32 to vector<16x16xf32>
    %48 = arith.subf %47, %46 : vector<16x16xf32>
    %49 = vector.shape_cast %48 : vector<16x16xf32> to vector<1x16x16xf32>
    %cst_28 = arith.constant dense<0.000000e+00> : vector<1xf32>
    %50 = vector.multi_reduction <add>, %49, %cst_28 [1, 2] : vector<1x16x16xf32> to vector<1xf32>
    %51 = vector.shape_cast %50 : vector<1xf32> to vector<1x1x1xf32>
    %52 = vector.extract %51[0, 0, 0] : f32 from vector<1x1x1xf32>
    %53 = vector.broadcast %52 : f32 to vector<1x1xf32>
    %54 = arith.addf %44, %53 : vector<1x1xf32>
    %c0_29 = arith.constant 0 : index
    %c0_30 = arith.constant 0 : index
    %55 = vector.load %arg5[%c0_29, %c0_30] : memref<1x1xf32, #tpu.memory_space<vmem>>, vector<1x1xf32>
    tpu.vector_store %arg5[%c0_29, %c0_30], %54 {strides = array<i32>} : memref<1x1xf32, #tpu.memory_space<vmem>>, vector<1x1xf32>,
    %56 = arith.subf %13, %14 : vector<16x1xf32>
    %c0_31 = arith.constant 0 : index
    %c0_32 = arith.constant 0 : index
    %57 = vector.load %arg4[%c0_31, %c0_32] : memref<1x1xf32, #tpu.memory_space<vmem>>, vector<1x1xf32>
    %58 = arith.mulf %56, %56 : vector<16x1xf32>
    %59 = arith.mulf %58, %15 : vector<16x1xf32>
    %60 = vector.shape_cast %59 : vector<16x1xf32> to vector<1x16x1xf32>
    %cst_33 = arith.constant dense<0.000000e+00> : vector<1xf32>
    %61 = vector.multi_reduction <add>, %60, %cst_33 [1, 2] : vector<1x16x1xf32> to vector<1xf32>
    %62 = vector.shape_cast %61 : vector<1xf32> to vector<1x1x1xf32>
    %63 = vector.extract %62[0, 0, 0] : f32 from vector<1x1x1xf32>
    %64 = vector.broadcast %63 : f32 to vector<1x1xf32>
    %65 = arith.addf %57, %64 : vector<1x1xf32>
    %c0_34 = arith.constant 0 : index
    %c0_35 = arith.constant 0 : index
    %66 = vector.load %arg4[%c0_34, %c0_35] : memref<1x1xf32, #tpu.memory_space<vmem>>, vector<1x1xf32>
    tpu.vector_store %arg4[%c0_34, %c0_35], %65 {strides = array<i32>} : memref<1x1xf32, #tpu.memory_space<vmem>>, vector<1x1xf32>,
    %c0_36 = arith.constant 0 : index
    %c0_37 = arith.constant 0 : index
    %67 = vector.load %arg6[%c0_36, %c0_37] : memref<1x1xf32, #tpu.memory_space<vmem>>, vector<1x1xf32>
    %cst_38 = arith.constant 1.000000e+00 : f32
    %68 = vector.broadcast %cst_38 : f32 to vector<16x1xf32>
    %69 = arith.subf %68, %13 : vector<16x1xf32>
    %70 = arith.mulf %13, %69 : vector<16x1xf32>
    %71 = vector.shape_cast %70 : vector<16x1xf32> to vector<1x16x1xf32>
    %cst_39 = arith.constant dense<0.000000e+00> : vector<1xf32>
    %72 = vector.multi_reduction <add>, %71, %cst_39 [1, 2] : vector<1x16x1xf32> to vector<1xf32>
    %73 = vector.shape_cast %72 : vector<1xf32> to vector<1x1x1xf32>
    %74 = vector.extract %73[0, 0, 0] : f32 from vector<1x1x1xf32>
    %75 = vector.broadcast %74 : f32 to vector<1x1xf32>
    %76 = arith.addf %67, %75 : vector<1x1xf32>
    %c0_40 = arith.constant 0 : index
    %c0_41 = arith.constant 0 : index
    %77 = vector.load %arg6[%c0_40, %c0_41] : memref<1x1xf32, #tpu.memory_space<vmem>>, vector<1x1xf32>
    tpu.vector_store %arg6[%c0_40, %c0_41], %76 {strides = array<i32>} : memref<1x1xf32, #tpu.memory_space<vmem>>, vector<1x1xf32>,
    return
  }
  func.func @transform_0(%arg0: i32) -> (i32, i32, i32) {
    %c0_i32 = arith.constant 0 : i32
    %c0_i32_0 = arith.constant 0 : i32
    %c0_i32_1 = arith.constant 0 : i32
    return %c0_i32, %arg0, %c0_i32_0 : i32, i32, i32
  }
  func.func @transform_1(%arg0: i32) -> (i32, i32) {
    %c0_i32 = arith.constant 0 : i32
    %c0_i32_0 = arith.constant 0 : i32
    return %arg0, %c0_i32 : i32, i32
  }
  func.func @transform_2(%arg0: i32) -> (i32, i32) {
    %c0_i32 = arith.constant 0 : i32
    %c0_i32_0 = arith.constant 0 : i32
    %c0_i32_1 = arith.constant 0 : i32
    return %c0_i32, %c0_i32_0 : i32, i32
  }
  func.func @transform_3(%arg0: i32) -> (i32, i32) {
    %c0_i32 = arith.constant 0 : i32
    %c0_i32_0 = arith.constant 0 : i32
    %c0_i32_1 = arith.constant 0 : i32
    return %c0_i32, %c0_i32_0 : i32, i32
  }
  func.func @transform_4(%arg0: i32) -> (i32, i32) {
    %c0_i32 = arith.constant 0 : i32
    %c0_i32_0 = arith.constant 0 : i32
    %c0_i32_1 = arith.constant 0 : i32
    return %c0_i32, %c0_i32_0 : i32, i32
  }
  func.func @transform_5(%arg0: i32) -> (i32, i32) {
    %c0_i32 = arith.constant 0 : i32
    %c0_i32_0 = arith.constant 0 : i32
    %c0_i32_1 = arith.constant 0 : i32
    return %c0_i32, %c0_i32_0 : i32, i32
  }
}

</mosaic_0001>

<bundles_post_ra>
// kernel: tpu_custom_call.1
= control target key start
LH: loop header
LB: loop body
LE: loop exit
PB: predicated region body
PF: predicated region fallthrough
CT: control target
= control target key end

     0   :  { %11 = vsyncpa [#allocation3], 0  ;;  %s560_s0 = inlined_call_operand.hbm [shape: f32[4,16,16], index: 0, kind: input, shape index: {}]   ;;  %s561_s1 = inlined_call_operand.vmem [shape: f32[16,8], index: 1, kind: input, shape index: {}]   ;;  %s562_s2 = inlined_call_operand.vmem [shape: f32[8,16], index: 2, kind: input, shape index: {}]   ;;  %s563_s3 = inlined_call_operand.hbm [shape: f32[1,1], index: 3, kind: output, shape index: {0}]   ;;  %s564_s4 = inlined_call_operand.hbm [shape: f32[1,1], index: 4, kind: output, shape index: {1}]   ;;  %s565_s5 = inlined_call_operand.hbm [shape: f32[1,1], index: 5, kind: output, shape index: {2}]  }
   0x1   :  { %12 = vsyncpa [#allocation4], 0 }
   0x2   :  { %13 = vsyncpa [#allocation7], 0  ;;  %s18_s20 = sshll.u32 %s560_s0, 4  ;;  %s457_s21 = smov [#allocation2]   ;;  %s19_s20 = int_to_ptr.hbm [resolvable:$true] %s18_s20 }
   0x3   :  { %s20_s22 = sshll.u32 %s457_s21, 4  ;;  %s458_s23 = smov 128   ;;  %s21_s22 = int_to_ptr.vmem [resolvable:$true] %s20_s22 }
   0x4   :  { %s459_s24 = smov 8  }
   0x5   :  { %26 = dma.hbm_to_vmem [thread:$0]  %s19_s20, 1024, %s21_s22, [#allocation3], %s458_s23, %s458_s23, %s459_s24  }
   0x6   :  { %451 = dma.done.wait [#allocation3], 1024  }
   0x7   :  { %452 = vsyncadd [#allocation3], 4294966272  ;;  %v460_v0 = vmov 1   ;;  %v461_v1 = vmov 0   ;;  %v54_v2 = vld [vmem:[%s561_s1] sm:$0xff]  ;;  %s462_s27 = smov 127  }
   0x8   :  { %341 = vset.pattern.permute.xlu1 %v460_v0  ;;  %340 = vset.pattern.permute.xlu0 %v460_v0  ;;  %s463_s0 = smov 126   ;;  %v55_v3 = vld [vmem:[%s561_s1 + $0x8] sm:$0xff]  ;;  %v464_v4 = vmov 2   ;;  %v246_v5 = vsub.f32 1.0, %v54_v2  ;;  %v344_v14 = vld [vmem:[%s562_s2] ss:$0 sm:$0xff] }
   0x9   :  { %339 = vset.pattern.permute.xlu2 %v461_v1  ;;  %202 = vrot.lane.b32.xlu0 %v54_v2, %s462_s27  ;;  %v247_v15 = vsub.f32 1.0, %v55_v3  ;;  %v43_v20 = vld [vmem:[#allocation2] sm:$0xff]  ;;  %v46_v31 = vld [vmem:[#allocation2 + $0x10] sm:$0xff]  ;;  %v44_v33 = vld [vmem:[#allocation2 + $0x8] sm:$0xff]  ;;  %s291_s13 = sshll.u32 %s564_s4, 4  ;;  %s280_s16 = sshll.u32 %s563_s3, 4  ;;  %s292_s13 = int_to_ptr.hbm [resolvable:$true] %s291_s13  ;;  %s281_s16 = int_to_ptr.hbm [resolvable:$true] %s280_s16 }
   0xa   :  { %213 = vrot.lane.b32.xlu1 %v54_v2, %s463_s0  ;;  %74 = vperm.xlu2 %339, %v54_v2   ;;  %v248_v6 = vmul.f32 %v246_v5, %v54_v2  ;;  %v345_v25 = vld [vmem:[%s562_s2 + $0x1] ss:$0 sm:$0xff]  ;;  %v346_v26 = vld [vmem:[%s562_s2 + $0x2] ss:$0 sm:$0xff]  ;;  %v47_v34 = vld [vmem:[#allocation2 + $0x18] sm:$0xff]  ;;  %s466_s2 = smov [#allocation6]  }
   0xb   :  { %v249_v22 = vmul.f32 %v247_v15, %v55_v3  ;;  %v49_v43 = vld [vmem:[#allocation2 + $0x20] sm:$0xff]  ;;  %v50_v51 = vld [vmem:[#allocation2 + $0x28] sm:$0xff]  ;;  %v523_v55 = vld [vmem:[#allocation2 + $0x30] sm:$0xff]  ;;  %s289_s10 = sshll.u32 %s466_s2, 4  ;;  %s467_s17 = smov [#allocation5]   ;;  %s290_s10 = int_to_ptr.vmem [resolvable:$true] %s289_s10 }
   0xc   :  { %v525_v59 = vld [vmem:[#allocation2 + $0x38] sm:$0xff]  ;;  %s278_s18 = sshll.u32 %s467_s17, 4  ;;  %s468_s19 = smov [#allocation8]   ;;  %s279_s18 = int_to_ptr.vmem [resolvable:$true] %s278_s18 }
   0xd   :  { %s300_s20 = sshll.u32 %s468_s19, 4  ;;  %s302_s24 = sshll.u32 %s565_s5, 4  ;;  %s301_s20 = int_to_ptr.vmem [resolvable:$true] %s300_s20  ;;  %s303_s24 = int_to_ptr.hbm [resolvable:$true] %s302_s24 }
  0x11   :  { %204 = vrot.lane.b32.xlu0 %v55_v3, %s462_s27 }
  0x12   :  { %215 = vrot.lane.b32.xlu1 %v55_v3, %s463_s0  ;;  %78 = vperm.xlu2 %339, %v55_v3  }
  0x19   :  { %87 = vperm.xlu0 %340, %v54_v2  }
  0x1a   :  { %91 = vperm.xlu1 %341, %v55_v3   ;;  %342 = vset.pattern.permute.xlu2 %v464_v4 }
  0x1b   :  { %61 = vperm.xlu2 %342, %v54_v2  }
  0x22   :  { %343 = vset.pattern.permute.xlu1 %v464_v4 }
  0x23   :  { %66 = vperm.xlu1 %343, %v55_v3  }
  0x2b   :  { %252 = vrot.lane.b32.xlu1 %v248_v6, %s463_s0 }
  0x64   :  { %v75_v7 = vpop.permute.xlu2 %74 }
  0x65   :  { %v81_v19 = vsub.f32 %v344_v14, %v75_v7 }
  0x67   :  { %v83_v24 = vsub.f32 %v81_v19, %v43_v20 }
  0x69   :  { %v98_v32 = vmul.f32 %v83_v24, %v83_v24 }
  0x6c   :  { %v79_v12 = vpop.permute.xlu2 %78 }
  0x6d   :  { %v82_v28 = vsub.f32 %v344_v14, %v79_v12 }
  0x6f   :  { %v84_v39 = vsub.f32 %v82_v28, %v44_v33 }
  0x71   :  { %v99_v45 = vmul.f32 %v84_v39, %v84_v39 }
  0x75   :  { %v62_v27 = vpop.permute.xlu2 %61 }
  0x76   :  { %v70_v37 = vmul.f32 %v346_v26, %v62_v27 }
  0x78   :  { %v100_v42 = vmul.f32 %v98_v32, %v70_v37 }
  0x7a   :  { %v102_v47 = vmul.f32 %v100_v42, %v49_v43 }
  0x7b   :  { %v203_v8 = vpop.permute.xlu0 %202 }
  0x7c   :  { %v214_v9 = vpop.permute.xlu1 %213  ;;  %v208_v10 = vsub.f32 %v54_v2, %v203_v8  ;;  %v110_v54 = vmul.f32 %v102_v47, %v102_v47 }
  0x7e   :  { %v211_v11 = vmul.f32 %v208_v10, %v208_v10  ;;  %v112_v62 = vadd.f32 %v110_v54, %v523_v55 }
  0x80   :  { %v219_v13 = vmul.f32 %v214_v9, %v211_v11  ;;  %347 = vrcp.f32 %v112_v62  ;;  %vm119_vm0 = vweird.f32 %v112_v62 }
  0x82   :  { %223 = vrot.lane.b32.xlu2 %v219_v13, %s463_s0 }
  0x83   :  { %v205_v16 = vpop.permute.xlu0 %204 }
  0x84   :  { %v216_v17 = vpop.permute.xlu1 %215  ;;  %v209_v18 = vsub.f32 %v55_v3, %v205_v16 }
  0x86   :  { %v212_v21 = vmul.f32 %v209_v18, %v209_v18  ;;  %v348_v2 = vpop.eup %347 }
  0x87   :  { %v115_v6 = vmul.f32 %v348_v2, %v112_v62  ;;  %vm120_vm1 = vweird.f32 %v348_v2 }
  0x88   :  { %v220_v23 = vmul.f32 %v216_v17, %v212_v21  ;;  %v125_v17 = vand.u32 2147483648, %v112_v62  ;;  %vm531_vm2 = vmor %vm119_vm0, %vm120_vm1  ;;  %vm185_vm0 = vcmask 130048   ;;  %vm229_vm1 = vcmask 7168  }
  0x89   :  { %v116_v10 = vsub.f32 1.0, %v115_v6  ;;  %v465_v6 = vmov 0.0  }
  0x8a   :  { %225 = vrot.lane.b32.xlu0 %v220_v23, %s463_s0  ;;  %254 = vrot.lane.b32.xlu2 %v249_v22, %s463_s0  ;;  %v123_v22 = vand.u32 2147483647, %v112_v62  ;;  %v126_v24 = vor.u32 1.1754944e-38, %v125_v17 }
  0x8b   :  { %v88_v30 = vpop.permute.xlu0 %87  ;;  %v117_v14 = vmul.f32 %v348_v2, %v116_v10 }
  0x8c   :  { %v92_v29 = vpop.permute.xlu1 %91  ;;  %v94_v36 = vsub.f32 %v345_v25, %v88_v30  ;;  %vm124_vm5 = vcmp.eq.f32.partialorder %v123_v22, 8.507059e+37 }
  0x8d   :  { %v95_v35 = vsub.f32 %v345_v25, %v92_v29  ;;  %v118_v21 = vadd.f32 %v348_v2, %v117_v14 }
  0x8e   :  { %v96_v38 = vsub.f32 %v94_v36, %v46_v31 }
  0x8f   :  { %v97_v40 = vsub.f32 %v95_v35, %v47_v34 }
  0x90   :  { %v104_v41 = vmul.f32 %v96_v38, %v96_v38 }
  0x91   :  { %v105_v46 = vmul.f32 %v97_v40, %v97_v40 }
  0x92   :  { %v106_v44 = vmul.f32 %v104_v41, %v70_v37 }
  0x94   :  { %v108_v49 = vmul.f32 %v106_v44, %v49_v43 }
  0x95   :  { %v67_v48 = vpop.permute.xlu1 %66 }
  0x96   :  { %v71_v50 = vmul.f32 %v346_v26, %v67_v48  ;;  %v144_v56 = vmul.f32 %v108_v49, %v108_v49  ;;  %v122_v26 = vsel %vm531_vm2, %v348_v2, %v118_v21  ;;  %vm39_vm2 = vcmask 0  }
  0x97   :  { %v127_v35 = vsel %vm124_vm5, %v126_v24, %v122_v26  ;;  %41 = vst.msk [vmem:[#allocation6] sm:$0x1] %vm39_vm2, %v465_v6 }
  0x98   :  { %v101_v52 = vmul.f32 %v99_v45, %v71_v50  ;;  %v107_v53 = vmul.f32 %v105_v46, %v71_v50  ;;  %v146_v63 = vadd.f32 %v144_v56, %v523_v55  ;;  %40 = vst.msk [vmem:[#allocation5] sm:$0x1] %vm39_vm2, %v465_v6 }
  0x99   :  { %42 = vst.msk [vmem:[#allocation8] sm:$0x1] %vm39_vm2, %v465_v6 }
  0x9a   :  { %v103_v57 = vmul.f32 %v101_v52, %v50_v51  ;;  %v109_v58 = vmul.f32 %v107_v53, %v50_v51  ;;  %349 = vrcp.f32 %v146_v63  ;;  %v159_v19 = vand.u32 2147483648, %v146_v63 }
  0x9b   :  { %vm153_vm7 = vweird.f32 %v146_v63  ;;  %v157_v33 = vand.u32 2147483647, %v146_v63 }
  0x9c   :  { %v111_v60 = vmul.f32 %v103_v57, %v103_v57  ;;  %v145_v61 = vmul.f32 %v109_v58, %v109_v58  ;;  %v160_v34 = vor.u32 1.1754944e-38, %v159_v19 }
  0x9d   :  { %vm158_vm13 = vcmp.eq.f32.partialorder %v157_v33, 8.507059e+37  ;;  %v253_v54 = vpop.permute.xlu1 %252 }
  0x9e   :  { %v113_v0 = vadd.f32 %v111_v60, %v525_v59  ;;  %v147_v1 = vadd.f32 %v145_v61, %v525_v59  ;;  %v258_v56 = vsel %vm229_vm1, %v253_v54, 0.0 }
  0x9f   :  { %v210_v24 = vld [vmem:[#allocation5] sm:$0x1] }
  0xa0   :  { %351 = vrcp.f32 %v113_v0  ;;  %v350_v3 = vpop.eup %349  ;;  %v140_v18 = vand.u32 2147483648, %v113_v0  ;;  %vm134_vm3 = vweird.f32 %v113_v0  ;;  %v138_v28 = vand.u32 2147483647, %v113_v0 }
  0xa1   :  { %353 = vrcp.f32 %v147_v1  ;;  %v149_v8 = vmul.f32 %v350_v3, %v146_v63  ;;  %v174_v29 = vand.u32 2147483648, %v147_v1  ;;  %vm154_vm9 = vweird.f32 %v350_v3 }
  0xa2   :  { %v141_v31 = vor.u32 1.1754944e-38, %v140_v18  ;;  %vm139_vm8 = vcmp.eq.f32.partialorder %v138_v28, 8.507059e+37  ;;  %vm155_vm10 = vmor %vm153_vm7, %vm154_vm9  ;;  %vm168_vm11 = vweird.f32 %v147_v1  ;;  %v172_v38 = vand.u32 2147483647, %v147_v1 }
  0xa3   :  { %v150_v12 = vsub.f32 1.0, %v149_v8  ;;  %v175_v39 = vor.u32 1.1754944e-38, %v174_v29 }
  0xa4   :  { %vm173_vm15 = vcmp.eq.f32.partialorder %v172_v38, 8.507059e+37 }
  0xa5   :  { %v151_v16 = vmul.f32 %v350_v3, %v150_v12 }
  0xa6   :  { %v352_v4 = vpop.eup %351 }
  0xa7   :  { %v354_v5 = vpop.eup %353  ;;  %v130_v7 = vmul.f32 %v352_v4, %v113_v0  ;;  %vm135_vm4 = vweird.f32 %v352_v4  ;;  %v152_v32 = vadd.f32 %v350_v3, %v151_v16 }
  0xa8   :  { %v164_v9 = vmul.f32 %v354_v5, %v147_v1  ;;  %vm537_vm6 = vmor %vm134_vm3, %vm135_vm4  ;;  %vm169_vm12 = vweird.f32 %v354_v5 }
  0xa9   :  { %v131_v11 = vsub.f32 1.0, %v130_v7  ;;  %v156_v37 = vsel %vm155_vm10, %v350_v3, %v152_v32  ;;  %vm170_vm14 = vmor %vm168_vm11, %vm169_vm12 }
  0xaa   :  { %v165_v13 = vsub.f32 1.0, %v164_v9  ;;  %v161_v41 = vsel %vm158_vm13, %v160_v34, %v156_v37 }
  0xab   :  { %v132_v15 = vmul.f32 %v352_v4, %v131_v11  ;;  %v179_v43 = vadd.f32 %v161_v41, %v127_v35 }
  0xac   :  { %v166_v20 = vmul.f32 %v354_v5, %v165_v13  ;;  %v178_v13 = vld [vmem:[#allocation6] sm:$0x1] }
  0xad   :  { %v133_v25 = vadd.f32 %v352_v4, %v132_v15  ;;  %v181_v46 = vmul.f32 %v179_v43, %v523_v55 }
  0xae   :  { %v167_v36 = vadd.f32 %v354_v5, %v166_v20 }
  0xaf   :  { %v137_v30 = vsel %vm537_vm6, %v352_v4, %v133_v25  ;;  %v183_v48 = vsub.f32 2.0, %v181_v46  ;;  %v245_v25 = vld [vmem:[#allocation8] sm:$0x1] }
  0xb0   :  { %v142_v40 = vsel %vm139_vm8, %v141_v31, %v137_v30  ;;  %v171_v42 = vsel %vm170_vm14, %v354_v5, %v167_v36 }
  0xb1   :  { %v176_v44 = vsel %vm173_vm15, %v175_v39, %v171_v42  ;;  %v186_v50 = vsel %vm185_vm0, %v183_v48, 0.0 }
  0xb2   :  { %v180_v45 = vadd.f32 %v176_v44, %v142_v40 }
  0xb4   :  { %v182_v47 = vmul.f32 %v180_v45, %v525_v59 }
  0xb6   :  { %v184_v49 = vsub.f32 2.0, %v182_v47 }
  0xb8   :  { %v187_v51 = vsel %vm185_vm0, %v184_v49, 0.0 }
  0xb9   :  { %v188_v52 = vadd.f32 %v187_v51, %v186_v50 }
  0xbb   :  { %189 = vadd.xlane.f32.xlu0 %v188_v52 }
  0xdc   :  { %v224_v53 = vpop.permute.xlu2 %223 }
  0xdd   :  { %v230_v62 = vsel %vm229_vm1, %v224_v53, 0.0 }
  0xe4   :  { %v255_v57 = vpop.permute.xlu2 %254 }
  0xe5   :  { %v259_v58 = vsel %vm229_vm1, %v255_v57, 0.0 }
  0xe6   :  { %v260_v60 = vadd.f32 %v259_v58, %v258_v56 }
  0xe8   :  { %261 = vadd.xlane.f32.xlu2 %v260_v60 }
  0xfc   :  { %v226_v61 = vpop.permute.xlu0 %225 }
  0xfd   :  { %v231_v55 = vsel %vm229_vm1, %v226_v61, 0.0 }
  0xfe   :  { %v232_v63 = vadd.f32 %v231_v55, %v230_v62 }
 0x100   :  { %233 = vadd.xlane.f32.xlu1 %v232_v63 }
 0x12e   :  { %v190_v59 = vpop.xlane.xlu0 %189 }
 0x12f   :  { %v191_v0 = vrot.slane %v190_v59, 4 }
 0x131   :  { %v192_v1 = vadd.f32 %v191_v0, %v190_v59 }
 0x133   :  { %v193_v2 = vrot.slane %v192_v1, 2 }
 0x135   :  { %v194_v3 = vadd.f32 %v193_v2, %v192_v1 }
 0x137   :  { %v195_v4 = vrot.slane %v194_v3, 1 }
 0x139   :  { %v196_v5 = vadd.f32 %v195_v4, %v194_v3 }
 0x13b   :  { %321 = vpush %v196_v5 }
 0x15b   :  { %v262_v7 = vpop.xlane.xlu2 %261 }
 0x15c   :  { %v263_v8 = vrot.slane %v262_v7, 4 }
 0x15e   :  { %v264_v9 = vadd.f32 %v263_v8, %v262_v7 }
 0x160   :  { %v265_v10 = vrot.slane %v264_v9, 2 }
 0x162   :  { %v266_v15 = vadd.f32 %v265_v10, %v264_v9 }
 0x164   :  { %v267_v20 = vrot.slane %v266_v15, 1 }
 0x166   :  { %v268_v23 = vadd.f32 %v267_v20, %v266_v15 }
 0x16c   :  { %s322_s14 = spop %321 }
 0x16d   :  { %v198_v16 = vstv %s322_s14 }
 0x16e   :  { %v199_v18 = vadd.f32 %v198_v16, %v178_v13 }
 0x170   :  { %201 = vst.msk [vmem:[#allocation6] sm:$0x1] %vm39_vm2, %v199_v18 }
 0x171   :  { %294 = dma.vmem_to_hbm [thread:$0]  %s290_s10, 16, %s292_s13, [#allocation7]  }
 0x173   :  { %v234_v11 = vpop.xlane.xlu1 %233 }
 0x174   :  { %v235_v12 = vrot.slane %v234_v11, 4 }
 0x176   :  { %v236_v14 = vadd.f32 %v235_v12, %v234_v11 }
 0x178   :  { %v237_v17 = vrot.slane %v236_v14, 2 }
 0x17a   :  { %v238_v19 = vadd.f32 %v237_v17, %v236_v14 }
 0x17c   :  { %v239_v21 = vrot.slane %v238_v19, 1 }
 0x17e   :  { %v240_v22 = vadd.f32 %v239_v21, %v238_v19 }
 0x180   :  { %323 = vpush %v240_v22 }
 0x181   :  { %325 = vpush %v268_v23 }
 0x1b1   :  { %s324_s21 = spop %323 }
 0x1b2   :  { %v242_v26 = vstv %s324_s21  ;;  %s326_s25 = spop %325 }
 0x1b3   :  { %v243_v27 = vadd.f32 %v242_v26, %v210_v24  ;;  %v270_v28 = vstv %s326_s25 }
 0x1b4   :  { %v271_v29 = vadd.f32 %v270_v28, %v245_v25 }
 0x1b5   :  { %244 = vst.msk [vmem:[#allocation5] sm:$0x1] %vm39_vm2, %v243_v27 }
 0x1b6   :  { %272 = vst.msk [vmem:[#allocation8] sm:$0x1] %vm39_vm2, %v271_v29  ;;  %283 = dma.vmem_to_hbm [thread:$0]  %s279_s18, 16, %s281_s16, [#allocation4]  }
 0x1b7   :  { %305 = dma.vmem_to_hbm [thread:$0]  %s301_s20, 16, %s303_s24, [#allocation7]  }
 0x1b8   :  { %453 = dma.done.wait [#allocation4], 16  }
 0x1b9   :  { %454 = vsyncadd [#allocation4], 4294967280 }
 0x1ba   :  { %455 = dma.done.wait [#allocation7], 32  }
 0x1bb   :  { %456 = vsyncadd [#allocation7], 4294967264 }
 0x1bc   :  { %318 = vsyncpa [#allocation3], 1 }
 0x1bd   :  { %319 = vsyncpa [#allocation4], 1 }
 0x1be   :  { %320 = vsyncpa [#allocation7], 1 }

</bundles_post_ra>
